<compile_context>
chip_gen: v6e
topology: v6e:2x2x1
jax: 0.10.0
libtpu: 0.0.40
codegen_flags: <defaults>
</compile_context>

<pallas_src>
import functools

import jax
import jax.numpy as jnp
from jax import lax
from jax.experimental import pallas as pl
from jax.experimental.pallas import tpu as pltpu


# --------------------------- per-generation budget ---------------------------

def _default_vmem_limit():
    """Scoped VMEM budget: generous on 128 MiB parts (v5e/v6e), conservative on v7x."""
    cap = 64 * 1024 * 1024
    try:
        info = pltpu.get_tpu_info()
        cap = getattr(info, "vmem_capacity_bytes", cap) or cap
    except Exception:
        pass
    if cap >= 128 * 1024 * 1024:
        return 80 * 1024 * 1024          # v5e / v6e: bigger tiles, fewer grid steps
    return 44 * 1024 * 1024              # v7x: 64 MiB physical, leave headroom


_VMEM_LIMIT = _default_vmem_limit()


def _cparams(*sem):
    return pltpu.CompilerParams(dimension_semantics=sem,
                                vmem_limit_bytes=_VMEM_LIMIT)


# ----------------------------- tiling helpers ------------------------------

def _round_up(x, m):
    return ((x + m - 1) // m) * m


def _pick_row_block(dim, preferred=1024):
    """Largest multiple-of-16 divisor of dim <= preferred, else the full dim."""
    if dim <= preferred:
        return dim
    t = (preferred // 16) * 16
    while t >= 16:
        if dim % t == 0:
            return t
        t -= 16
    return dim


def _pick_lane_block(dim, preferred=512):
    """Largest multiple-of-128 divisor of dim <= preferred, else the full dim.

    Big lane dims (vocab) are pre-padded to a multiple of 128 at construction time,
    so the full-dim fallback only triggers for small (<=512) dimensions."""
    if dim <= preferred:
        return dim
    t = (preferred // 128) * 128
    while t >= 128:
        if dim % t == 0:
            return t
        t -= 128
    return dim


def _kv_pad_len(t):
    """KV-cache length rounded up so a 128/256 key-block divides it."""
    return t if t <= 128 else _round_up(t, 128)


def _pick_kv_block(tk):
    for t in (256, 128):
        if tk % t == 0:
            return t
    return tk


# ----------------------------- in-kernel math -------------------------------

def _erf(z):
    # Abramowitz & Stegun 7.1.26 (|err| < 1.5e-7): exact-GELU to ~f32 precision.
    a1, a2, a3, a4, a5 = 0.254829592, -0.284496736, 1.421413741, -1.453152027, 1.061405429
    p = 0.3275911
    az = jnp.abs(z)
    t = 1.0 / (1.0 + p * az)
    poly = ((((a5 * t + a4) * t + a3) * t + a2) * t + a1) * t
    y = 1.0 - poly * jnp.exp(-az * az)
    return jnp.where(z >= 0, y, -y)


def _gelu_exact(x):
    return 0.5 * x * (1.0 + _erf(x * 0.7071067811865476))


def _layernorm_f32(x, g, b):
    mean = jnp.mean(x, axis=-1, keepdims=True)
    xc = x - mean
    var = jnp.mean(xc * xc, axis=-1, keepdims=True)
    return xc * lax.rsqrt(var + 1e-5) * g + b


# ----------------------------- matmul kernels -------------------------------

def _ln_linear_kernel(x_ref, g_ref, b_ref, w_ref, bias_ref, o_ref, *,
                      activation, apply_ln):
    x = x_ref[...].astype(jnp.float32)
    if apply_ln:
        x = _layernorm_f32(x, g_ref[...], b_ref[...])
    y = jnp.dot(x.astype(w_ref.dtype), w_ref[...],
                preferred_element_type=jnp.float32)
    y = y + bias_ref[...]
    if activation == "gelu":
        y = _gelu_exact(y)
    o_ref[...] = y.astype(o_ref.dtype)


def ln_linear(x, g, b, w, bias, *, activation=None, apply_ln=True,
              out_dtype=jnp.bfloat16, tm=1024, tn=512):
    """y = act(LN(x) @ w + bias), tiled over rows and output columns."""
    M, K = x.shape
    N = w.shape[1]
    bm = _pick_row_block(M, tm)          # bm == M for typical prefill/decode sizes ->
    bn = _pick_lane_block(N, tn)         # each weight column block streamed once
    return pl.pallas_call(
        functools.partial(_ln_linear_kernel, activation=activation,
                          apply_ln=apply_ln),
        out_shape=jax.ShapeDtypeStruct((M, N), out_dtype),
        grid=(M // bm, N // bn),
        in_specs=[
            pl.BlockSpec((bm, K), lambda i, j: (i, 0)),
            pl.BlockSpec((1, K), lambda i, j: (0, 0)),
            pl.BlockSpec((1, K), lambda i, j: (0, 0)),
            pl.BlockSpec((K, bn), lambda i, j: (0, j)),
            pl.BlockSpec((1, bn), lambda i, j: (0, j)),
        ],
        out_specs=pl.BlockSpec((bm, bn), lambda i, j: (i, j)),
        compiler_params=_cparams("parallel", "parallel"),
    )(x, g, b, w, bias)


def _linear_residual_kernel(res_ref, x_ref, w_ref, bias_ref, o_ref):
    y = jnp.dot(x_ref[...].astype(w_ref.dtype), w_ref[...],
                preferred_element_type=jnp.float32)
    o_ref[...] = (res_ref[...].astype(jnp.float32) + y + bias_ref[...]
                  ).astype(o_ref.dtype)


def linear_residual(res, x, w, bias, *, tm=1024, tn=512):
    """y = res + x @ w + bias (fused projection + residual add), bf16 residual stream."""
    M, K = x.shape
    N = w.shape[1]
    bm = _pick_row_block(M, tm)
    bn = _pick_lane_block(N, tn)
    return pl.pallas_call(
        _linear_residual_kernel,
        out_shape=jax.ShapeDtypeStruct((M, N), jnp.bfloat16),
        grid=(M // bm, N // bn),
        in_specs=[
            pl.BlockSpec((bm, bn), lambda i, j: (i, j)),
            pl.BlockSpec((bm, K), lambda i, j: (i, 0)),
            pl.BlockSpec((K, bn), lambda i, j: (0, j)),
            pl.BlockSpec((1, bn), lambda i, j: (0, j)),
        ],
        out_specs=pl.BlockSpec((bm, bn), lambda i, j: (i, j)),
        compiler_params=_cparams("parallel", "parallel"),
    )(res, x, w, bias)


def _ln_logits_kernel(x_ref, g_ref, b_ref, e_ref, o_ref):
    xn = _layernorm_f32(x_ref[...].astype(jnp.float32), g_ref[...], b_ref[...])
    # (bm, D) x (bv, D) -> (bm, bv): contract directly against the (vocab, D)
    # embedding; no materialized vocab x D transpose.
    o_ref[...] = lax.dot_general(
        xn.astype(e_ref.dtype), e_ref[...],
        (((1,), (1,)), ((), ())), preferred_element_type=jnp.float32)


def ln_logits(x, g, b, emb, *, tm=1024, tv=512):
    """logits = LN(x) @ emb.T, tiled over (rows, vocab); vocab pre-padded to 128-mult."""
    M, K = x.shape
    V = emb.shape[0]
    bm = _pick_row_block(M, tm)
    bv = _pick_lane_block(V, tv)
    return pl.pallas_call(
        _ln_logits_kernel,
        out_shape=jax.ShapeDtypeStruct((M, V), jnp.float32),
        grid=(M // bm, V // bv),
        in_specs=[
            pl.BlockSpec((bm, K), lambda i, j: (i, 0)),
            pl.BlockSpec((1, K), lambda i, j: (0, 0)),
            pl.BlockSpec((1, K), lambda i, j: (0, 0)),
            pl.BlockSpec((bv, K), lambda i, j: (j, 0)),
        ],
        out_specs=pl.BlockSpec((bm, bv), lambda i, j: (i, j)),
        compiler_params=_cparams("parallel", "parallel"),
    )(x, g, b, emb)


# --------------------------- flash attention kernel -------------------------

def _flash_attn_kernel(info_ref, q_ref, k_ref, v_ref, o_ref,
                       m_sc, l_sc, acc_sc, *, n_head, scale, causal):
    kb = pl.program_id(1)
    n_valid = info_ref[2]                 # number of key blocks that hold real data

    @pl.when(kb == 0)
    def _init():
        m_sc[...] = jnp.full_like(m_sc, -1e30)
        l_sc[...] = jnp.zeros_like(l_sc)
        acc_sc[...] = jnp.zeros_like(acc_sc)

    @pl.when(kb < n_valid)                # fully-invalid cache-tail blocks: no compute
    def _compute():
        Tq = q_ref.shape[2]
        bk = k_ref.shape[2]
        offset = info_ref[0]
        valid_len = info_ref[1]
        col = lax.broadcasted_iota(jnp.int32, (Tq, bk), 1) + kb * bk
        invalid = col >= valid_len
        if causal:
            row = lax.broadcasted_iota(jnp.int32, (Tq, bk), 0) + offset
            invalid = jnp.logical_or(invalid, col > row)
        neg = jnp.where(invalid, -1e9, 0.0).astype(jnp.float32)

        def head_body(h, carry):
            q = q_ref[0, h]               # (Tq, Dh) -- head slab starts at lane 0
            k = k_ref[0, h]               # (bk, Dh)
            v = v_ref[0, h]
            s = lax.dot_general(q, k, (((1,), (1,)), ((), ())),
                                preferred_element_type=jnp.float32) * scale + neg
            m_prev = m_sc[h]
            m_new = jnp.maximum(m_prev, jnp.max(s, axis=-1, keepdims=True))
            alpha = jnp.exp(m_prev - m_new)
            p = jnp.exp(s - m_new)
            l_sc[h] = alpha * l_sc[h] + jnp.sum(p, axis=-1, keepdims=True)
            acc_sc[h] = alpha * acc_sc[h] + jnp.dot(
                p.astype(v.dtype), v, preferred_element_type=jnp.float32)
            m_sc[h] = m_new
            return carry

        lax.fori_loop(0, n_head, head_body, 0)

    @pl.when(kb == n_valid - 1)           # finalize once the last valid block is in
    def _finalize():
        def fin_body(h, carry):
            o_ref[0, h] = (acc_sc[h] * pl.reciprocal(l_sc[h], approx=True)
                           ).astype(o_ref.dtype)
            return carry

        lax.fori_loop(0, n_head, fin_body, 0)


def mha(q4, k4, v4, offset, valid_len, *, causal):
    """Flash attention.  q4: (B, H, Tq, Dh) bf16, k4/v4: (B, H, Tk, Dh) bf16.

    `valid_len` (offset + T for causal self-attention, the audio length for
    cross-attention) bounds both the mask and the key-block index_map, so the
    unwritten / padded KV-cache tail is neither DMA'd nor matmul'd."""
    B, H, Tq, Dh = q4.shape
    Tk = k4.shape[2]
    bk = _pick_kv_block(Tk)
    nkb = Tk // bk
    scale = float(Dh) ** -0.5

    off = jnp.asarray(offset, jnp.int32)
    vl = jnp.asarray(valid_len, jnp.int32)
    nvb = ((vl + (bk - 1)) // bk).astype(jnp.int32)
    info = jnp.stack([off, vl, nvb])

    return pl.pallas_call(
        functools.partial(_flash_attn_kernel, n_head=H, scale=scale, causal=causal),
        out_shape=jax.ShapeDtypeStruct((B, H, Tq, Dh), jnp.bfloat16),
        grid_spec=pltpu.PrefetchScalarGridSpec(
            num_scalar_prefetch=1,
            grid=(B, nkb),
            in_specs=[
                pl.BlockSpec((1, H, Tq, Dh), lambda b, kb, info: (b, 0, 0, 0)),
                # clamp -> invalid blocks repeat the last valid block index, so the
                # pipeline does not issue new DMAs for the cache tail.
                pl.BlockSpec((1, H, bk, Dh),
                             lambda b, kb, info: (b, 0, jnp.minimum(kb, info[2] - 1), 0)),
                pl.BlockSpec((1, H, bk, Dh),
                             lambda b, kb, info: (b, 0, jnp.minimum(kb, info[2] - 1), 0)),
            ],
            out_specs=pl.BlockSpec((1, H, Tq, Dh), lambda b, kb, info: (b, 0, 0, 0)),
            scratch_shapes=[
                pltpu.VMEM((H, Tq, 1), jnp.float32),    # running max
                pltpu.VMEM((H, Tq, 1), jnp.float32),    # running denom
                pltpu.VMEM((H, Tq, Dh), jnp.float32),   # running numerator
            ],
        ),
        compiler_params=_cparams("parallel", "arbitrary"),
    )(info, q4, k4, v4)


# ------------------------------- params -------------------------------------

def init_params(key, vocab, n_ctx, d_model, n_head, n_layer):
    keys = jax.random.split(key, 2 + n_layer)

    def dense(k, fan_in, fan_out):
        return (jax.random.normal(k, (fan_in, fan_out), jnp.float32) * 0.02
                ).astype(jnp.bfloat16)

    fz = lambda n: jnp.zeros((1, n), jnp.float32)
    fo = lambda n: jnp.ones((1, n), jnp.float32)

    params = {
        "token_emb": (jax.random.normal(keys[0], (vocab, d_model), jnp.float32)
                      * 0.02).astype(jnp.bfloat16),
        "pos_emb": jax.random.normal(keys[1], (n_ctx, d_model), jnp.float32) * 0.01,
        "ln_g": fo(d_model), "ln_b": fz(d_model),
        "blocks": [],
    }
    for l in range(n_layer):
        ks = jax.random.split(keys[2 + l], 10)
        wq = dense(ks[0], d_model, d_model)
        wk = dense(ks[1], d_model, d_model)
        wv = dense(ks[2], d_model, d_model)
        blk = {
            "attn_ln_g": fo(d_model), "attn_ln_b": fz(d_model),
            # fused QKV weight (D, 3D); k has no bias in Whisper (zero middle third)
            "w_qkv": jnp.concatenate([wq, wk, wv], axis=1),
            "b_qkv": fz(3 * d_model),
            "wo": dense(ks[3], d_model, d_model), "bo": fz(d_model),
            "xattn_ln_g": fo(d_model), "xattn_ln_b": fz(d_model),
            "xwq": dense(ks[4], d_model, d_model), "xbq": fz(d_model),
            # fused cross K|V weight (D, 2D); k has no bias
            "xw_kv": jnp.concatenate([dense(ks[5], d_model, d_model),
                                      dense(ks[6], d_model, d_model)], axis=1),
            "xb_kv": fz(2 * d_model),
            "xwo": dense(ks[7], d_model, d_model), "xbo": fz(d_model),
            "mlp_ln_g": fo(d_model), "mlp_ln_b": fz(d_model),
            "w1": dense(ks[8], d_model, 4 * d_model), "b1": fz(4 * d_model),
            "w2": dense(ks[9], 4 * d_model, d_model), "b2": fz(d_model),
        }
        params["blocks"].append(blk)
    return params


# ------------------------------- forward -------------------------------------

def _decoder_forward(params, x, xa, cache, offset, *, n_head, n_vocab, prefill):
    tok = params["token_emb"]                 # (V_pad, D) bf16 (tied embedding)
    D = tok.shape[1]
    B, T = x.shape
    H = n_head
    Dh = D // H

    h = jnp.take(tok, x, axis=0).astype(jnp.float32)
    pos = lax.dynamic_slice_in_dim(params["pos_emb"], offset, T, axis=0)
    h2 = (h + pos[None, :, :]).reshape(B * T, D).astype(jnp.bfloat16)

    self_k, self_v = cache["self_k"], cache["self_v"]      # (L, B, H, Cmax, Dh) bf16
    cross_k, cross_v = cache["cross_k"], cache["cross_v"]  # (L, B, H, Ta_pad, Dh) bf16
    Ta = xa.shape[1]
    Tap = cross_k.shape[3]
    i0 = jnp.int32(0)
    off32 = jnp.asarray(offset, jnp.int32)
    ones_d = jnp.ones((1, D), jnp.float32)
    zeros_d = jnp.zeros((1, D), jnp.float32)

    for li, blk in enumerate(params["blocks"]):
        # ---- masked self-attention: LN + fused QKV, flash attention, out-proj + res
        qkv = ln_linear(h2, blk["attn_ln_g"], blk["attn_ln_b"],
                        blk["w_qkv"], blk["b_qkv"])
        qkv = qkv.reshape(B, T, 3, H, Dh).transpose(2, 0, 3, 1, 4)   # (3, B, H, T, Dh)
        q4, k_new, v_new = qkv[0], qkv[1], qkv[2]
        # TODO(synk): write new K/V into the cache from the QKV kernel itself via
        #             input_output_aliases to drop the XLA dynamic_update_slice.
        self_k = lax.dynamic_update_slice(
            self_k, k_new[None], (jnp.int32(li), i0, i0, off32, i0))
        self_v = lax.dynamic_update_slice(
            self_v, v_new[None], (jnp.int32(li), i0, i0, off32, i0))
        a = mha(q4, self_k[li], self_v[li], offset, off32 + T, causal=True)
        a = a.transpose(0, 2, 1, 3).reshape(B * T, D)
        h2 = linear_residual(h2, a, blk["wo"], blk["bo"])

        # ---- cross-attention over encoded audio xa (K/V cached at prefill)
        qx = ln_linear(h2, blk["xattn_ln_g"], blk["xattn_ln_b"],
                       blk["xwq"], blk["xbq"])
        qx4 = qx.reshape(B, T, H, Dh).transpose(0, 2, 1, 3)
        if prefill:
            kvx = ln_linear(xa.reshape(B * Ta, D), ones_d, zeros_d,
                            blk["xw_kv"], blk["xb_kv"], apply_ln=False)
            kvx = kvx.reshape(B, Ta, 2, H, Dh).transpose(2, 0, 3, 1, 4)  # (2,B,H,Ta,Dh)
            pad = ((0, 0), (0, 0), (0, Tap - Ta), (0, 0))
            xk = jnp.pad(kvx[0], pad)
            xv = jnp.pad(kvx[1], pad)
            cross_k = lax.dynamic_update_slice(
                cross_k, xk[None], (jnp.int32(li), i0, i0, i0, i0))
            cross_v = lax.dynamic_update_slice(
                cross_v, xv[None], (jnp.int32(li), i0, i0, i0, i0))
        else:
            xk, xv = cross_k[li], cross_v[li]
        xo = mha(qx4, xk, xv, 0, Ta, causal=False)
        xo = xo.transpose(0, 2, 1, 3).reshape(B * T, D)
        h2 = linear_residual(h2, xo, blk["xwo"], blk["xbo"])

        # ---- MLP: LN + w1 + exact GELU fused; w2 + residual fused
        m = ln_linear(h2, blk["mlp_ln_g"], blk["mlp_ln_b"],
                      blk["w1"], blk["b1"], activation="gelu")
        h2 = linear_residual(h2, m, blk["w2"], blk["b2"])

    logits = ln_logits(h2, params["ln_g"], params["ln_b"], tok)
    logits = logits.reshape(B, T, tok.shape[0])[..., :n_vocab]
    new_cache = {"self_k": self_k, "self_v": self_v,
                 "cross_k": cross_k, "cross_v": cross_v}
    return logits, new_cache


# donate the cache (arg 3) so dynamic_update_slice aliases in place (no full-cache copy)
_decoder_forward_jit = jax.jit(_decoder_forward,
                               static_argnames=("n_head", "n_vocab", "prefill"),
                               donate_argnums=(3,))


class OpenVINOTextDecoder:
    """Whisper-style text decoder; forward(x, xa, kv_cache) -> (logits, kv_cache)."""
    # TODO(synk): the OpenVINO runtime plumbing (core.read_model / compile_model /
    # ov.Tensor conversion) has no Pallas equivalent; only the decoder math is here.

    def __init__(self, params, n_head, n_ctx):
        V, D = params["token_emb"].shape
        self.n_vocab = V
        v_pad = _round_up(max(V, 128), 128)     # lane-dense logits tiles for any vocab
        if v_pad != V:
            params = dict(params)
            params["token_emb"] = jnp.pad(params["token_emb"],
                                          ((0, v_pad - V), (0, 0)))
        self.params = params
        self.n_head = n_head
        self.n_ctx = n_ctx                      # static max text context

    def _empty_cache(self, B, Ta, D, n_layer):
        H = self.n_head
        Dh = D // H
        cmax = _kv_pad_len(self.n_ctx)
        tap = _kv_pad_len(Ta)
        z = lambda *s: jnp.zeros(s, jnp.bfloat16)
        return {"self_k": z(n_layer, B, H, cmax, Dh),
                "self_v": z(n_layer, B, H, cmax, Dh),
                "cross_k": z(n_layer, B, H, tap, Dh),
                "cross_v": z(n_layer, B, H, tap, Dh)}

    def forward(self, x, xa, kv_cache=None):
        B, T = x.shape
        D = self.params["token_emb"].shape[1]
        n_layer = len(self.params["blocks"])
        if kv_cache is None:
            cache, offset, prefill = self._empty_cache(B, xa.shape[1], D, n_layer), 0, True
        else:
            (cache, offset), prefill = kv_cache, False
        assert offset + T <= self.n_ctx, "sequence exceeds max text context"
        logits, new_cache = _decoder_forward_jit(
            self.params, x, xa.astype(jnp.float32), cache,
            jnp.asarray(offset, jnp.int32),
            n_head=self.n_head, n_vocab=self.n_vocab, prefill=prefill)
        return logits, (new_cache, offset + T)

    __call__ = forward


# --------------------------------- driver ------------------------------------

if __name__ == "__main__":
    key = jax.random.PRNGKey(0)
    B, T = 2, 8
    vocab, n_ctx = 64, 32
    d_model, n_head, n_layer = 32, 4, 2
    n_audio_ctx = 16

    k_params, k_tok, k_audio, k_tok2 = jax.random.split(key, 4)
    params = init_params(k_params, vocab, n_ctx, d_model, n_head, n_layer)
    decoder = OpenVINOTextDecoder(params, n_head=n_head, n_ctx=n_ctx)

    x = jax.random.randint(k_tok, (B, T), 0, vocab, dtype=jnp.int32)
    xa = jax.random.normal(k_audio, (B, n_audio_ctx, d_model), jnp.float32)

    # --- lightweight numerical check of the flash-attention kernel ---
    Hh, Dh, Tq, Tk, off_chk, vlen = 4, 8, 8, 32, 4, 12
    kq, kk, kv = jax.random.split(jax.random.PRNGKey(1), 3)
    q_t = jax.random.normal(kq, (1, Hh, Tq, Dh), jnp.float32).astype(jnp.bfloat16)
    k_t = jax.random.normal(kk, (1, Hh, Tk, Dh), jnp.float32).astype(jnp.bfloat16)
    v_t = jax.random.normal(kv, (1, Hh, Tk, Dh), jnp.float32).astype(jnp.bfloat16)
    out_k = mha(q_t, k_t, v_t, off_chk, vlen, causal=True).astype(jnp.float32)
    qf, kf, vf = (a.astype(jnp.float32) for a in (q_t, k_t, v_t))
    s_ref = jnp.einsum("bhqd,bhkd->bhqk", qf, kf) * (Dh ** -0.5)
    colr = jnp.arange(Tk)[None, None, None, :]
    rowr = jnp.arange(Tq)[None, None, :, None] + off_chk
    s_ref = jnp.where((colr > rowr) | (colr >= vlen), -1e9, s_ref)
    attn_ref = jnp.einsum("bhqk,bhkd->bhqd", jax.nn.softmax(s_ref, axis=-1), vf)
    out_k = jax.block_until_ready(out_k)
    assert float(jnp.max(jnp.abs(out_k - attn_ref))) < 5e-2

    # step 1: prefill (no kv_cache)
    logits, kv_cache = decoder(x, xa, kv_cache=None)
    logits = jax.block_until_ready(logits)
    assert logits.shape == (B, T, vocab)
    assert bool(jnp.all(jnp.isfinite(logits)))

    # steps 2..3: autoregressive decode reusing the static-shape kv_cache
    # (same compilation for every decode step; only the offset scalar changes)
    for _ in range(2):
        k_tok2, sub = jax.random.split(k_tok2)
        x_new = jax.random.randint(sub, (B, 1), 0, vocab, dtype=jnp.int32)
        logits2, kv_cache = decoder(x_new, xa, kv_cache=kv_cache)
    logits2 = jax.block_until_ready(logits2)
    assert logits2.shape == (B, 1, vocab)
    assert bool(jnp.all(jnp.isfinite(logits2)))
    cache_dict, length = kv_cache
    assert length == T + 2
    assert cache_dict["self_k"].shape == (n_layer, B, n_head,
                                          _kv_pad_len(n_ctx), d_model // n_head)

    print("KERNEL_OK")
</pallas_src>

<mosaic_0001>
module attributes {stable_mosaic.version = 11 : i64} {
  func.func @_flash_attn_kernel(%arg0: i32, %arg1: i32, %arg2: memref<3xi32, #tpu.memory_space<smem>>, %arg3: memref<1x4x8x8xbf16, #tpu.memory_space<vmem>>, %arg4: memref<1x4x32x8xbf16, #tpu.memory_space<vmem>>, %arg5: memref<1x4x32x8xbf16, #tpu.memory_space<vmem>>, %arg6: memref<1x4x8x8xbf16, #tpu.memory_space<vmem>>, %arg7: memref<4x8x1xf32, #tpu.memory_space<vmem>>, %arg8: memref<4x8x1xf32, #tpu.memory_space<vmem>>, %arg9: memref<4x8x8xf32, #tpu.memory_space<vmem>>) attributes {dimension_semantics = [#tpu.dimension_semantics<parallel>, #tpu.dimension_semantics<arbitrary>], iteration_bounds = array<i64: 1, 1>, scalar_prefetch = 1 : i64, scratch_operands = 3 : i64, tpu.core_type = #tpu.core_type<tc>, window_params = [{transform_indices = @transform_0, window_bounds = array<i64: 1, 4, 8, 8>}, {transform_indices = @transform_1, window_bounds = array<i64: 1, 4, 32, 8>}, {transform_indices = @transform_2, window_bounds = array<i64: 1, 4, 32, 8>}, {transform_indices = @transform_3, window_bounds = array<i64: 1, 4, 8, 8>}]} {
    %c2 = arith.constant 2 : index
    %0 = memref.load %arg2[%c2] : memref<3xi32, #tpu.memory_space<smem>>
    %c0_i32 = arith.constant 0 : i32
    %1 = arith.cmpi eq, %arg1, %c0_i32 : i32
    %2 = arith.extui %1 : i1 to i32
    %c0_i32_0 = arith.constant 0 : i32
    %3 = arith.cmpi ne, %2, %c0_i32_0 : i32
    scf.if %3 {
      %cst = arith.constant -1.000000e+30 : f32
      %11 = vector.broadcast %cst : f32 to vector<4x8x1xf32>
      %c0 = arith.constant 0 : index
      %c0_3 = arith.constant 0 : index
      %c0_4 = arith.constant 0 : index
      %12 = vector.load %arg7[%c0, %c0_3, %c0_4] : memref<4x8x1xf32, #tpu.memory_space<vmem>>, vector<4x8x1xf32>
      tpu.vector_store %arg7[%c0, %c0_3, %c0_4], %11 {strides = array<i32>} : memref<4x8x1xf32, #tpu.memory_space<vmem>>, vector<4x8x1xf32>,
      %cst_5 = arith.constant 0.000000e+00 : f32
      %13 = vector.broadcast %cst_5 : f32 to vector<4x8x1xf32>
      %c0_6 = arith.constant 0 : index
      %c0_7 = arith.constant 0 : index
      %c0_8 = arith.constant 0 : index
      %14 = vector.load %arg8[%c0_6, %c0_7, %c0_8] : memref<4x8x1xf32, #tpu.memory_space<vmem>>, vector<4x8x1xf32>
      tpu.vector_store %arg8[%c0_6, %c0_7, %c0_8], %13 {strides = array<i32>} : memref<4x8x1xf32, #tpu.memory_space<vmem>>, vector<4x8x1xf32>,
      %cst_9 = arith.constant 0.000000e+00 : f32
      %15 = vector.broadcast %cst_9 : f32 to vector<4x8x8xf32>
      %c0_10 = arith.constant 0 : index
      %c0_11 = arith.constant 0 : index
      %c0_12 = arith.constant 0 : index
      %16 = vector.load %arg9[%c0_10, %c0_11, %c0_12] : memref<4x8x8xf32, #tpu.memory_space<vmem>>, vector<4x8x8xf32>
      tpu.vector_store %arg9[%c0_10, %c0_11, %c0_12], %15 {strides = array<i32>} : memref<4x8x8xf32, #tpu.memory_space<vmem>>, vector<4x8x8xf32>,
    } else {
    }
    %4 = arith.cmpi slt, %arg1, %0 : i32
    %5 = arith.extui %4 : i1 to i32
    %c0_i32_1 = arith.constant 0 : i32
    %6 = arith.cmpi ne, %5, %c0_i32_1 : i32
    scf.if %6 {
      %c0 = arith.constant 0 : index
      %11 = memref.load %arg2[%c0] : memref<3xi32, #tpu.memory_space<smem>>
      %c1 = arith.constant 1 : index
      %12 = memref.load %arg2[%c1] : memref<3xi32, #tpu.memory_space<smem>>
      %13 = tpu.iota {dimensions = array<i32: 1>} : vector<8x32xi32>
      %c32_i32 = arith.constant 32 : i32
      %14 = arith.muli %arg1, %c32_i32 : i32
      %15 = vector.broadcast %14 : i32 to vector<8x32xi32>
      %16 = arith.addi %13, %15 : vector<8x32xi32>
      %17 = vector.broadcast %12 : i32 to vector<8x32xi32>
      %18 = arith.cmpi sge, %16, %17 : vector<8x32xi32>
      %19 = tpu.iota {dimensions = array<i32: 0>} : vector<8x32xi32>
      %20 = vector.broadcast %11 : i32 to vector<8x32xi32>
      %21 = arith.addi %19, %20 : vector<8x32xi32>
      %22 = arith.cmpi sgt, %16, %21 : vector<8x32xi32>
      %23 = arith.ori %18, %22 : vector<8x32xi1>
      %cst = arith.constant -1.000000e+09 : f32
      %cst_3 = arith.constant 0.000000e+00 : f32
      %24 = vector.broadcast %cst : f32 to vector<8x32xf32>
      %25 = vector.broadcast %cst_3 : f32 to vector<8x32xf32>
      %26 = arith.select %23, %24, %25 : vector<8x32xi1>, vector<8x32xf32>
      %c0_i32_4 = arith.constant 0 : i32
      %c4_i32 = arith.constant 4 : i32
      %27 = arith.addi %c0_i32_4, %c4_i32 : i32
      %c1_i32_5 = arith.constant 1 : i32
      scf.for %arg10 = %c0_i32_4 to %27 step %c1_i32_5  : i32 {
        %c0_7 = arith.constant 0 : index
        %28 = arith.index_cast %arg10 : i32 to index
        %c0_8 = arith.constant 0 : index
        %c0_9 = arith.constant 0 : index
        %29 = vector.load %arg3[%c0_7, %28, %c0_8, %c0_9] : memref<1x4x8x8xbf16, #tpu.memory_space<vmem>>, vector<1x1x8x8xbf16>
        %30 = vector.shape_cast %29 : vector<1x1x8x8xbf16> to vector<8x8xbf16>
        %c0_10 = arith.constant 0 : index
        %31 = arith.index_cast %arg10 : i32 to index
        %c0_11 = arith.constant 0 : index
        %c0_12 = arith.constant 0 : index
        %32 = vector.load %arg4[%c0_10, %31, %c0_11, %c0_12] : memref<1x4x32x8xbf16, #tpu.memory_space<vmem>>, vector<1x1x32x8xbf16>
        %33 = vector.shape_cast %32 : vector<1x1x32x8xbf16> to vector<32x8xbf16>
        %c0_13 = arith.constant 0 : index
        %34 = arith.index_cast %arg10 : i32 to index
        %c0_14 = arith.constant 0 : index
        %c0_15 = arith.constant 0 : index
        %35 = vector.load %arg5[%c0_13, %34, %c0_14, %c0_15] : memref<1x4x32x8xbf16, #tpu.memory_space<vmem>>, vector<1x1x32x8xbf16>
        %36 = vector.shape_cast %35 : vector<1x1x32x8xbf16> to vector<32x8xbf16>
        %cst_16 = arith.constant dense<0.000000e+00> : vector<8x32xf32>
        %37 = tpu.matmul %30, %33, %cst_16 {dimension_numbers = #tpu.dot_dimension_numbers<[1], [1], [0], [0], [0, 0, 1, 0], [], []>} : vector<8x8xbf16>, vector<32x8xbf16>, vector<8x32xf32> -> vector<8x32xf32>
        %cst_17 = arith.constant 0.353553385 : f32
        %38 = vector.broadcast %cst_17 : f32 to vector<8x32xf32>
        %39 = arith.mulf %37, %38 : vector<8x32xf32>
        %40 = arith.addf %39, %26 : vector<8x32xf32>
        %41 = arith.index_cast %arg10 : i32 to index
        %c0_18 = arith.constant 0 : index
        %c0_19 = arith.constant 0 : index
        %42 = vector.load %arg7[%41, %c0_18, %c0_19] : memref<4x8x1xf32, #tpu.memory_space<vmem>>, vector<1x8x1xf32>
        %43 = vector.shape_cast %42 : vector<1x8x1xf32> to vector<8x1xf32>
        %cst_20 = arith.constant dense<0xFF800000> : vector<8xf32>
        %44 = vector.multi_reduction <maximumf>, %40, %cst_20 [1] : vector<8x32xf32> to vector<8xf32>
        %45 = vector.shape_cast %44 : vector<8xf32> to vector<8x1xf32>
        %46 = arith.maximumf %43, %45 : vector<8x1xf32>
        %47 = arith.subf %43, %46 : vector<8x1xf32>
        %48 = math.exp %47 : vector<8x1xf32>
        %49 = vector.broadcast %46 : vector<8x1xf32> to vector<8x32xf32>
        %50 = arith.subf %40, %49 : vector<8x32xf32>
        %51 = math.exp %50 : vector<8x32xf32>
        %52 = arith.index_cast %arg10 : i32 to index
        %c0_21 = arith.constant 0 : index
        %c0_22 = arith.constant 0 : index
        %53 = vector.load %arg8[%52, %c0_21, %c0_22] : memref<4x8x1xf32, #tpu.memory_space<vmem>>, vector<1x8x1xf32>
        %54 = vector.shape_cast %53 : vector<1x8x1xf32> to vector<8x1xf32>
        %55 = arith.mulf %48, %54 : vector<8x1xf32>
        %cst_23 = arith.constant dense<0.000000e+00> : vector<8xf32>
        %56 = vector.multi_reduction <add>, %51, %cst_23 [1] : vector<8x32xf32> to vector<8xf32>
        %57 = vector.shape_cast %56 : vector<8xf32> to vector<8x1xf32>
        %58 = arith.addf %55, %57 : vector<8x1xf32>
        %59 = arith.index_cast %arg10 : i32 to index
        %c0_24 = arith.constant 0 : index
        %c0_25 = arith.constant 0 : index
        %60 = vector.load %arg8[%59, %c0_24, %c0_25] : memref<4x8x1xf32, #tpu.memory_space<vmem>>, vector<1x8x1xf32>
        %61 = vector.shape_cast %60 : vector<1x8x1xf32> to vector<8x1xf32>
        %62 = vector.shape_cast %58 : vector<8x1xf32> to vector<1x8x1xf32>
        tpu.vector_store %arg8[%59, %c0_24, %c0_25], %62 {strides = array<i32>} : memref<4x8x1xf32, #tpu.memory_space<vmem>>, vector<1x8x1xf32>,
        %63 = arith.index_cast %arg10 : i32 to index
        %c0_26 = arith.constant 0 : index
        %c0_27 = arith.constant 0 : index
        %64 = vector.load %arg9[%63, %c0_26, %c0_27] : memref<4x8x8xf32, #tpu.memory_space<vmem>>, vector<1x8x8xf32>
        %65 = vector.shape_cast %64 : vector<1x8x8xf32> to vector<8x8xf32>
        %66 = vector.broadcast %48 : vector<8x1xf32> to vector<8x8xf32>
        %67 = arith.mulf %66, %65 : vector<8x8xf32>
        %68 = arith.truncf %51 : vector<8x32xf32> to vector<8x32xbf16>
        %cst_28 = arith.constant dense<0.000000e+00> : vector<8x8xf32>
        %69 = tpu.matmul %68, %36, %cst_28 {dimension_numbers = #tpu.dot_dimension_numbers<[1], [0], [0], [1], [0, 0, 1, 1], [], []>} : vector<8x32xbf16>, vector<32x8xbf16>, vector<8x8xf32> -> vector<8x8xf32>
        %70 = arith.addf %67, %69 : vector<8x8xf32>
        %71 = arith.index_cast %arg10 : i32 to index
        %c0_29 = arith.constant 0 : index
        %c0_30 = arith.constant 0 : index
        %72 = vector.load %arg9[%71, %c0_29, %c0_30] : memref<4x8x8xf32, #tpu.memory_space<vmem>>, vector<1x8x8xf32>
        %73 = vector.shape_cast %72 : vector<1x8x8xf32> to vector<8x8xf32>
        %74 = vector.shape_cast %70 : vector<8x8xf32> to vector<1x8x8xf32>
        tpu.vector_store %arg9[%71, %c0_29, %c0_30], %74 {strides = array<i32>} : memref<4x8x8xf32, #tpu.memory_space<vmem>>, vector<1x8x8xf32>,
        %75 = arith.index_cast %arg10 : i32 to index
        %c0_31 = arith.constant 0 : index
        %c0_32 = arith.constant 0 : index
        %76 = vector.load %arg7[%75, %c0_31, %c0_32] : memref<4x8x1xf32, #tpu.memory_space<vmem>>, vector<1x8x1xf32>
        %77 = vector.shape_cast %76 : vector<1x8x1xf32> to vector<8x1xf32>
        %78 = vector.shape_cast %46 : vector<8x1xf32> to vector<1x8x1xf32>
        tpu.vector_store %arg7[%75, %c0_31, %c0_32], %78 {strides = array<i32>} : memref<4x8x1xf32, #tpu.memory_space<vmem>>, vector<1x8x1xf32>,
      }
      %c4_i32_6 = arith.constant 4 : i32
    } else {
    }
    %c1_i32 = arith.constant 1 : i32
    %7 = arith.subi %0, %c1_i32 : i32
    %8 = arith.cmpi eq, %arg1, %7 : i32
    %9 = arith.extui %8 : i1 to i32
    %c0_i32_2 = arith.constant 0 : i32
    %10 = arith.cmpi ne, %9, %c0_i32_2 : i32
    scf.if %10 {
      %c0_i32_3 = arith.constant 0 : i32
      %c4_i32 = arith.constant 4 : i32
      %11 = arith.addi %c0_i32_3, %c4_i32 : i32
      %c1_i32_4 = arith.constant 1 : i32
      scf.for %arg10 = %c0_i32_3 to %11 step %c1_i32_4  : i32 {
        %12 = arith.index_cast %arg10 : i32 to index
        %c0 = arith.constant 0 : index
        %c0_6 = arith.constant 0 : index
        %13 = vector.load %arg9[%12, %c0, %c0_6] : memref<4x8x8xf32, #tpu.memory_space<vmem>>, vector<1x8x8xf32>
        %14 = vector.shape_cast %13 : vector<1x8x8xf32> to vector<8x8xf32>
        %15 = arith.index_cast %arg10 : i32 to index
        %c0_7 = arith.constant 0 : index
        %c0_8 = arith.constant 0 : index
        %16 = vector.load %arg8[%15, %c0_7, %c0_8] : memref<4x8x1xf32, #tpu.memory_space<vmem>>, vector<1x8x1xf32>
        %17 = vector.shape_cast %16 : vector<1x8x1xf32> to vector<8x1xf32>
        %18 = tpu.reciprocal %17 {approx = true} : vector<8x1xf32> -> vector<8x1xf32>
        %19 = vector.broadcast %18 : vector<8x1xf32> to vector<8x8xf32>
        %20 = arith.mulf %14, %19 : vector<8x8xf32>
        %21 = arith.truncf %20 : vector<8x8xf32> to vector<8x8xbf16>
        %c0_9 = arith.constant 0 : index
        %22 = arith.index_cast %arg10 : i32 to index
        %c0_10 = arith.constant 0 : index
        %c0_11 = arith.constant 0 : index
        %23 = vector.load %arg6[%c0_9, %22, %c0_10, %c0_11] : memref<1x4x8x8xbf16, #tpu.memory_space<vmem>>, vector<1x1x8x8xbf16>
        %24 = vector.shape_cast %23 : vector<1x1x8x8xbf16> to vector<8x8xbf16>
        %25 = vector.shape_cast %21 : vector<8x8xbf16> to vector<1x1x8x8xbf16>
        tpu.vector_store %arg6[%c0_9, %22, %c0_10, %c0_11], %25 {strides = array<i32>} : memref<1x4x8x8xbf16, #tpu.memory_space<vmem>>, vector<1x1x8x8xbf16>,
      }
      %c4_i32_5 = arith.constant 4 : i32
    } else {
    }
    return
  }
  func.func @transform_0(%arg0: i32, %arg1: i32, %arg2: memref<3xi32, #tpu.memory_space<smem>>) -> (i32, i32, i32, i32) {
    %c0_i32 = arith.constant 0 : i32
    %c0_i32_0 = arith.constant 0 : i32
    %c0_i32_1 = arith.constant 0 : i32
    %c0_i32_2 = arith.constant 0 : i32
    return %arg0, %c0_i32, %c0_i32_0, %c0_i32_1 : i32, i32, i32, i32
  }
  func.func @transform_1(%arg0: i32, %arg1: i32, %arg2: memref<3xi32, #tpu.memory_space<smem>>) -> (i32, i32, i32, i32) {
    %c2 = arith.constant 2 : index
    %0 = memref.load %arg2[%c2] : memref<3xi32, #tpu.memory_space<smem>>
    %c1_i32 = arith.constant 1 : i32
    %1 = arith.subi %0, %c1_i32 : i32
    %2 = arith.minsi %arg1, %1 : i32
    %c0_i32 = arith.constant 0 : i32
    %c0_i32_0 = arith.constant 0 : i32
    %c0_i32_1 = arith.constant 0 : i32
    return %arg0, %c0_i32, %2, %c0_i32_0 : i32, i32, i32, i32
  }
  func.func @transform_2(%arg0: i32, %arg1: i32, %arg2: memref<3xi32, #tpu.memory_space<smem>>) -> (i32, i32, i32, i32) {
    %c2 = arith.constant 2 : index
    %0 = memref.load %arg2[%c2] : memref<3xi32, #tpu.memory_space<smem>>
    %c1_i32 = arith.constant 1 : i32
    %1 = arith.subi %0, %c1_i32 : i32
    %2 = arith.minsi %arg1, %1 : i32
    %c0_i32 = arith.constant 0 : i32
    %c0_i32_0 = arith.constant 0 : i32
    %c0_i32_1 = arith.constant 0 : i32
    return %arg0, %c0_i32, %2, %c0_i32_0 : i32, i32, i32, i32
  }
  func.func @transform_3(%arg0: i32, %arg1: i32, %arg2: memref<3xi32, #tpu.memory_space<smem>>) -> (i32, i32, i32, i32) {
    %c0_i32 = arith.constant 0 : i32
    %c0_i32_0 = arith.constant 0 : i32
    %c0_i32_1 = arith.constant 0 : i32
    %c0_i32_2 = arith.constant 0 : i32
    return %arg0, %c0_i32, %c0_i32_0, %c0_i32_1 : i32, i32, i32, i32
  }
}

</mosaic_0001>

<bundles_post_ra>
// kernel: tpu_custom_call.1
= control target key start
LH: loop header
LB: loop body
LE: loop exit
PB: predicated region body
PF: predicated region fallthrough
CT: control target
= control target key end

     0   :  { %s651_s0 = inlined_call_operand.vmem [shape: s32[3], index: 0, kind: input, shape index: {}]   ;;  %s652_s1 = inlined_call_operand.vmem [shape: bf16[1,4,8,8], index: 1, kind: input, shape index: {}]   ;;  %s653_s2 = inlined_call_operand.vmem [shape: bf16[1,4,32,8], index: 2, kind: input, shape index: {}]   ;;  %s654_s3 = inlined_call_operand.vmem [shape: bf16[1,4,32,8], index: 3, kind: input, shape index: {}]   ;;  %s655_s4 = inlined_call_operand.hbm [shape: bf16[1,4,8,8], index: 4, kind: output, shape index: {}]  }
   0x1   :  { %s9_s17 = sshll.u32 %s651_s0, 4  ;;  %s10_s17 = int_to_ptr.vmem [resolvable:$true] %s9_s17 }
   0x2   :  { %s493_s18 = scalar_lea.vmem %s10_s17, 16  ;;  %p498_p1 = scmp.lt.s32.totalorder %s10_s17, %s10_s17 }
   0x3   :  { %p494_p0 = scmp.ne.s32.totalorder %s10_s17, %s493_s18  ;;  %p499_p2 = scmp.lt.s32.totalorder %s493_s18, %s493_s18 }
   0x5   :  { %p500_p3 = por %p499_p2, %p498_p1 }
   0x7   :  { %p501_p4 = pnand %p500_p3, %p494_p0 }
   0x9   :  { %504 = shalt.err (!%p501_p4)  }
   0xa   :  { %s545_s19 = smov [#allocation6]  }
   0xb   :  { %12 = dma.vmem_to_smem %s10_s17, 16, %s545_s19, [#allocation5] }
   0xc   :  { %533 = dma.done.wait [#allocation5], 16 }
   0xd   :  { %534 = vsyncadd [#allocation5], 4294967280 }
   0xe   :  { %14 = sfence }
   0xf   :  { %15 = vsyncpa [#allocation8], 0  ;;  %s399_s20 = sld [smem:[#allocation6 + $0x2]]  ;;  %vm102_vm0 = vcmask 7168   ;;  %v546_v0 = vmov 0.0   ;;  %vm111_vm1 = vcmask 64512  }
  0x10   :  { %107 = vst.msk [vmem:[#allocation3] sm:$0xff] %vm102_vm0, %v546_v0  ;;  %108 = vst.msk [vmem:[#allocation3 + $0x8] sm:$0xff] %vm102_vm0, %v546_v0  ;;  %v547_v1 = vmov -1e+30  }
  0x11   :  { %109 = vst.msk [vmem:[#allocation3 + $0x10] sm:$0xff] %vm102_vm0, %v546_v0  ;;  %110 = vst.msk [vmem:[#allocation3 + $0x18] sm:$0xff] %vm102_vm0, %v546_v0 }
  0x12   :  { %103 = vst.msk [vmem:[#allocation2] sm:$0xff] %vm102_vm0, %v547_v1  ;;  %104 = vst.msk [vmem:[#allocation2 + $0x8] sm:$0xff] %vm102_vm0, %v547_v1 }
  0x13   :  { %105 = vst.msk [vmem:[#allocation2 + $0x10] sm:$0xff] %vm102_vm0, %v547_v1  ;;  %106 = vst.msk [vmem:[#allocation2 + $0x18] sm:$0xff] %vm102_vm0, %v547_v1 }
  0x14   :  { %112 = vst.msk [vmem:[#allocation4] sm:$0xff] %vm111_vm1, %v546_v0  ;;  %113 = vst.msk [vmem:[#allocation4 + $0x8] sm:$0xff] %vm111_vm1, %v546_v0 }
  0x15   :  { %114 = vst.msk [vmem:[#allocation4 + $0x10] sm:$0xff] %vm111_vm1, %v546_v0  ;;  %115 = vst.msk [vmem:[#allocation4 + $0x18] sm:$0xff] %vm111_vm1, %v546_v0  ;;  %s596_s0 = sadd.s32 4294967295, %s399_s20  ;;  %p411_p7 = scmp.le.s32.totalorder %s399_s20, 0 }
  0x16   :  { %p401_p5 = scmp.gt.s32.totalorder %s596_s0, 0  ;;  %s120_s30 = sld [smem:[#allocation6]] (!%p411_p7) }
  0x17   :  { %s412_s5 = sld [smem:[#allocation6 + $0x1]] (!%p411_p7) }
  0x18   :  { %s71_s21 = scalar_select %p401_p5, 0, %s596_s0 }
  0x1a   :  { %s402_s22 = sshll.u32 %s71_s21, 2 }
  0x1b   :  { %p73_p6 = scmp.lt.s32.totalorder %s402_s22, 3  ;;  %119 = sbr.rel (%p411_p7) target bundleno = 741 (0x2e5), region = 21 }
  0x1d   :  { %s657_s22 = smov (!%p73_p6, %s402_s22), 3 }
  0x1e   :  { %s403_s23 = sshll.u32 %s657_s22, 2 }
  0x1f   :  { %s603_s26 = scalar_lea.vmem %s653_s2, %s403_s23  ;;  %s608_s29 = scalar_lea.vmem %s654_s3, %s403_s23 }
  0x20   :  { %v122_v2 = vlaneseq  ;;  %v131_v5 = vstv %s120_s30  ;;  %v127_v6 = vstv %s412_s5  ;;  %v548_v8 = vmov 0.0   ;;  %s612_s2 = smov 0  }
  0x22   :  { %v130_v3 = vshrl.u32 %v122_v2, 7  ;;  %v123_v4 = vand.u32 127, %v122_v2 }
  0x24   :  { %v132_v7 = vadd.s32 %v131_v5, %v130_v3  ;;  %vm128_vm2 = vcmp.ge.s32.totalorder %v123_v4, %v127_v6 }
  0x26   :  { %vm133_vm3 = vcmp.gt.s32.totalorder %v123_v4, %v132_v7 }
  0x27   :  { %vm134_vm4 = vmor %vm128_vm2, %vm133_vm3 }
  0x28   :  { %v610_v9 = vsel %vm134_vm4, -1e+09, %v548_v8 }
  0x29 LB: > { %v549_v10 = vmov 0.0   ;;  %vm550_vm5 = vmmov 0   ;;  %s429_s3 = sshll.u32 %s539_s2, 4  ;;  %s413_s7 = sshll.u32 %s539_s2, 2  ;;  %vm223_vm6 = vcmask 261120   ;;  %v551_v23 = vmov 0   ;;  %s539_s2 = sphi %s612_s2, %s141_s2  }
  0x2a   : > { %437 = vmatprep.subr.bf16.mxu0 %v549_v10  ;;  %441 = vmatprep.mubr.msk.bf16.mxu0 %vm550_vm5, %v549_v10  ;;  %s147_s6 = scalar_lea.vmem %s603_s26, %s429_s3  ;;  %s143_s10 = scalar_lea.vmem %s652_s1, %s413_s7 }
  0x2b   : > { %445 = vmatprep.subr.bf16.mxu1 %v549_v10  ;;  %449 = vmatprep.mubr.msk.bf16.mxu1 %vm550_vm5, %v549_v10  ;;  %v482_v11 = vld [vmem:[%s147_s6 + $0x8] sm:$0xff]   ;;  %v483_v13 = vld [vmem:[%s147_s6] sm:$0xff]   ;;  %s631_s11 = sshll.u32 %s539_s2, 3  ;;  %s153_s13 = scalar_lea.vmem %s608_s29, %s429_s3 }
  0x2c   : > { %v176_v12 = vsel %vm111_vm1, %v482_v11, 0  ;;  %v173_v14 = vsel %vm111_vm1, %v483_v13, 0  ;;  %v144_v15 = vld [vmem:[%s143_s10] sm:$0xf]  ;;  %480 = vset.pattern.permute.xlu0 %v551_v23  ;;  %481 = vset.pattern.permute.xlu1 %v551_v23  ;;  %s221_s12 = scalar_lea.vmem [#allocation2], %s631_s11  ;;  %v484_v28 = vld [vmem:[%s153_s13 + $0x8] sm:$0xff]  }
  0x2d   : > { %438 = vmatpush3.bf16.xpose.msra.mxu0 %v176_v12  ;;  %v222_v24 = vld [vmem:[%s221_s12] sm:$0xff]  ;;  %446 = vmatpush3.bf16.msra.mxu1 %v484_v28  ;;  %s239_s14 = scalar_lea.vmem [#allocation3], %s631_s11  ;;  %s248_s15 = scalar_lea.vmem [#allocation4], %s631_s11 }
  0x2e   : > { %439 = vmatprep.subr.bf16.mxu0 %v549_v10  ;;  %v485_v29 = vld [vmem:[%s153_s13] sm:$0xff]   ;;  %447 = vmatprep.subr.bf16.mxu1 %v549_v10  ;;  %s141_s2 = sadd.s32 1, %s539_s2  }
  0x2f   : > { %v240_v38 = vld [vmem:[%s239_s14] sm:$0xff]  ;;  %p138_p8 = scmp.ge.s32.totalorder %s141_s2, 4  }
  0x30   : > { %v249_v42 = vld [vmem:[%s248_s15] sm:$0xff] }
  0x31   : > { %448 = vmatpush3.bf16.msra.mxu1 %v485_v29 }
  0x35   : > { %440 = vmatpush3.bf16.xpose.msra.mxu0 %v173_v14 }
  0x3c   : > { %442 = vmatmul.mubr.msk.bf16.vlgmr.msra.gmra.mxu0 %vm111_vm1, %v144_v15 }
  0xfc   : > { %v212_v16 = vpop.f32.mrf.mxu0 }
  0xfd   : > { %v218_v17 = vmul.f32 0.35355338, %v212_v16 }
  0xfe   : > { %v443_v18 = vpop.f32.mrf.mxu0 }
  0xff   : > { %v219_v19 = vadd.f32 %v218_v17, %v610_v9 }
 0x100   : > { %v215_v20 = vpop.f32.mrf.mxu0 }
 0x101   : > { %v224_v21 = vsel %vm223_vm6, %v219_v19, -inf }
 0x102   : > { %225 = vmax.xlane.f32.xlu0 %v224_v21  ;;  %v444_v22 = vpop.f32.mrf.mxu0 }
 0x18b   : > { %v226_v25 = vpop.xlane.xlu0 %225 }
 0x18c   : > { %v227_v26 = vmax.f32 %v222_v24, %v226_v25 }
 0x18e   : > { %v228_v27 = vsub.f32 %v222_v24, %v227_v26  ;;  %314 = vst.msk [vmem:[%s221_s12] sm:$0xff] %vm102_vm0, %v227_v26  ;;  %233 = vperm.xlu0 %480, %v227_v26  }
 0x190   : > { %v229_v34 = vmul.f32 1.442695, %v228_v27 }
 0x209   : > { %v234_v30 = vpop.permute.xlu0 %233 }
 0x20a   : > { %v236_v31 = vsub.f32 %v219_v19, %v234_v30 }
 0x20c   : > { %v237_v32 = vmul.f32 1.442695, %v236_v31 }
 0x20e   : > { %486 = vpow2.f32 %v237_v32 }
 0x20f   : > { %488 = vpow2.f32 %v229_v34 }
 0x21b   : > { %v487_v33 = vpop.eup %486 }
 0x21c   : > { %v242_v35 = vsel %vm223_vm6, %v487_v33, 0.0  ;;  %v256_v36 = vpack.c.bf16 %v487_v33, %v487_v33  ;;  %v489_v37 = vpop.eup %488 }
 0x21d   : > { %243 = vadd.xlane.f32.xlu1 %v242_v35  ;;  %v241_v39 = vmul.f32 %v489_v37, %v240_v38 }
 0x21e   : > { %450 = vmatmul.mubr.msk.bf16.vlgmr.msra.gmra.mxu1 %vm223_vm6, %v256_v36 }
 0x22e   : > { %252 = vperm.xlu1 %481, %v489_v37  }
 0x2a6   : > { %v244_v40 = vpop.xlane.xlu1 %243 }
 0x2a7   : > { %v245_v41 = vadd.f32 %v244_v40, %v241_v39 }
 0x2a9   : > { %247 = vst.msk [vmem:[%s239_s14] sm:$0xff] %vm102_vm0, %v245_v41 }
 0x2aa   : > { %v253_v43 = vpop.permute.xlu1 %252 }
 0x2ab   : > { %v255_v44 = vmul.f32 %v253_v43, %v249_v42 }
 0x2de   : > { %v306_v45 = vpop.f32.mrf.mxu1 }
 0x2df   : > { %v312_v46 = vadd.f32 %v306_v45, %v255_v44 }
 0x2e0   : > { %v451_v47 = vpop.f32.mrf.mxu1  ;;  %140 = sbr.rel (!%p138_p8) target bundleno = 41 (0x29), region = 73 }
 0x2e1   : > { %313 = vst.msk [vmem:[%s248_s15] sm:$0xff] %vm111_vm1, %v312_v46 }
 0x2e2   : > { %v309_v48 = vpop.f32.mrf.mxu1 }
 0x2e4   : > { %v452_v49 = vpop.f32.mrf.mxu1 }
 0x2e5 PF:  { %p426_p9 = scmp.ne.s32.totalorder %s596_s0, 0 }
 0x2e6   :  { %s541_s16 = smov (!%p426_p9), 0  }
 0x2e7   :  { %319 = sbr.rel (%p426_p9) target bundleno = 894 (0x37e), region = 32 }
 0x2ec LB: > { %v552_v50 = vmov 0   ;;  %s427_s17 = sshll.u32 %s543_s16, 3  ;;  %s428_s20 = sshll.u32 %s543_s16, 2  ;;  %vm341_vm7 = vcmask 60416   ;;  %s543_s16 = sphi %s541_s16, %s325_s16  }
 0x2ed   : > { %490 = vset.pattern.permute.xlu0 %v552_v50  ;;  %s329_s18 = scalar_lea.vmem [#allocation3], %s427_s17  ;;  %s327_s19 = scalar_lea.vmem [#allocation4], %s427_s17 }
 0x2ee   : > { %v330_v51 = vld [vmem:[%s329_s18] sm:$0xff]  ;;  %s340_s1 = scalar_lea.vmem [#allocation7], %s428_s20  ;;  %s325_s16 = sadd.s32 1, %s543_s16  }
 0x2ef   : > { %491 = vrcp.f32 %v330_v51  ;;  %v328_v53 = vld [vmem:[%s327_s19] sm:$0xff]  ;;  %p322_p10 = scmp.ge.s32.totalorder %s325_s16, 4  }
 0x2fc   : > { %v492_v52 = vpop.eup %491 }
 0x2fd   : > { %334 = vperm.xlu0 %490, %v492_v52  }
 0x378   : > { %v335_v54 = vpop.permute.xlu0 %334 }
 0x379   : > { %v337_v55 = vmul.f32 %v335_v54, %v328_v53  ;;  %324 = sbr.rel (!%p322_p10) target bundleno = 748 (0x2ec), region = 84 }
 0x37b   : > { %v338_v56 = vpack.c.bf16 %v337_v55, %v337_v55 }
 0x37d   : > { %342 = vst.msk [vmem:[%s340_s1] sm:$0xf] %vm341_vm7, %v338_v56 }
 0x37e PF:  { %s553_s0 = smov [#allocation7]  }
 0x37f   :  { %s348_s21 = sshll.u32 %s553_s0, 4  ;;  %s349_s21 = int_to_ptr.vmem [resolvable:$true] %s348_s21 }
 0x380   :  { %s505_s22 = scalar_lea.vmem %s349_s21, 256  ;;  %p510_p12 = scmp.lt.s32.totalorder %s349_s21, %s349_s21 }
 0x381   :  { %p506_p11 = scmp.ne.s32.totalorder %s349_s21, %s505_s22  ;;  %p511_p13 = scmp.lt.s32.totalorder %s505_s22, %s505_s22 }
 0x383   :  { %p512_p0 = por %p511_p13, %p510_p12 }
 0x385   :  { %p513_p1 = pnand %p512_p0, %p506_p11 }
 0x387   :  { %516 = shalt.err (!%p513_p1)
}
 0x388   :  { %s554_s23 = smov 64   ;;  %s555_s24 = smov 4  }
 0x389   :  { %354 = dma.vmem_to_hbm [thread:$0]  %s349_s21, 256, %s655_s4, [#allocation8], %s554_s23, %s554_s23, %s555_s24  }
 0x38a   :  { %535 = dma.done.wait [#allocation8], 256  }
 0x38b   :  { %536 = vsyncadd [#allocation8], 4294967040 }
 0x38c   :  { %358 = vsyncpa [#allocation8], 1 }

</bundles_post_ra>
